<compile_context>
chip_gen: v6e
topology: v6e:2x2x1
jax: 0.10.0
libtpu: 0.0.40
codegen_flags: <defaults>
</compile_context>

<pallas_src>
import math
from functools import partial

import jax
import jax.numpy as jnp
from jax.experimental import pallas as pl
from jax.experimental.pallas import tpu as pltpu

_EPS = 1e-6
_MM_DTYPE = jnp.bfloat16            # MXU input dtype (f32 accumulation)


# -------------------------- generation-dependent config -----------------------

def _tpu_kind():
    try:
        return jax.devices()[0].device_kind.lower()
    except Exception:
        return ""


_KIND = _tpu_kind()
_BIG_VMEM_GEN = ("v5" in _KIND) or ("v6" in _KIND)         # 128 MiB physical VMEM
_VMEM_LIMIT = (96 * 1024 * 1024) if _BIG_VMEM_GEN else (32 * 1024 * 1024)
_ROW_TILE_TARGET = 1024 if _BIG_VMEM_GEN else 512
# bf16 exp only on generations with a bf16 EUP (v6e / v7x); f32 on v5e and older.
_BF16_EXP = not any(t in _KIND for t in ("v2", "v3", "v4", "v5"))


# ----------------------------- in-kernel helpers ------------------------------

def _ln(x, g, b, eps):
    """PyTorch-style LayerNorm: unbiased std, (std + eps) denominator. f32 math."""
    d = x.shape[-1]
    mean = jnp.mean(x, axis=-1, keepdims=True)
    diff = x - mean
    var_unbiased = jnp.sum(diff * diff, axis=-1, keepdims=True) / (d - 1)
    std = jnp.sqrt(var_unbiased)
    return g * diff / (std + eps) + b


# ------------------------------- Pallas kernels --------------------------------

def attn_kernel(x_ref, mask_ref, g_ref, b_ref, wqkv_ref, bqkv_ref, wo_ref, bo_ref,
                o_ref, lnx_scr, acc_scr, *, eps, scale, bf16_exp):
    """Fused LN1 + per-head QKV + attention + output proj + residual.

    grid = (B, H); h is the accumulation ('arbitrary') axis.
      x:    [1, S, D]  f32   (block index constant over h -> fetched once per b)
      mask: [1, 1, S]  f32   additive (0 keep / -1e9 masked)
      wqkv: [1, 3, D, dk] bf16   head-h slice (q/k/v stacked on axis 1)
      bqkv: [1, 3, 1, dk] f32
      wo:   [1, dk, D] bf16      head-h rows of the output projection
      out:  [1, S, D]  f32 = x + sum_h softmax(q_h k_h^T/sqrt(dk)+mask) v_h @ Wo_h + bo
    """
    h = pl.program_id(1)

    @pl.when(h == 0)
    def _():
        # LN(x) computed once per batch element, cached in VMEM for all heads.
        lnx_scr[...] = _ln(x_ref[0], g_ref[...], b_ref[...], eps).astype(_MM_DTYPE)
        # residual + output-projection bias seed the accumulator
        acc_scr[...] = x_ref[0] + bo_ref[...]

    y = lnx_scr[...]                                   # [S, D] bf16
    bq = bqkv_ref[0, 0]                                # [1, dk] f32
    bk = bqkv_ref[0, 1]
    bv = bqkv_ref[0, 2]

    q = jnp.dot(y, wqkv_ref[0, 0], preferred_element_type=jnp.float32) + bq  # [S, dk]
    k = jnp.dot(y, wqkv_ref[0, 1], preferred_element_type=jnp.float32) + bk
    v = jnp.dot(y, wqkv_ref[0, 2], preferred_element_type=jnp.float32) + bv

    # scores = (q/sqrt(dk)) @ k^T without materializing the transpose
    s = jax.lax.dot_general(
        (q * scale).astype(_MM_DTYPE), k.astype(_MM_DTYPE),
        dimension_numbers=(((1,), (1,)), ((), ())),
        preferred_element_type=jnp.float32,
    )                                                  # [S, S] f32
    s = s + mask_ref[0]                                # broadcast [1, S] over rows
    s = s - jnp.max(s, axis=-1, keepdims=True)
    if bf16_exp:                                       # EUP bf16 path (v6e / v7x)
        e = jnp.exp(s.astype(jnp.bfloat16)).astype(jnp.float32)
    else:
        e = jnp.exp(s)
    p = e * pl.reciprocal(jnp.sum(e, axis=-1, keepdims=True), approx=True)

    ctx = jnp.dot(p.astype(_MM_DTYPE), v.astype(_MM_DTYPE),
                  preferred_element_type=jnp.float32)  # [S, dk]
    acc_scr[...] += jnp.dot(ctx.astype(_MM_DTYPE), wo_ref[0],
                            preferred_element_type=jnp.float32)

    @pl.when(h == pl.num_programs(1) - 1)
    def _():
        o_ref[0] = acc_scr[...]


def ln_ffn_residual_kernel(x_ref, g_ref, b_ref, w1_ref, b1_ref, w2_ref, b2_ref,
                           o_ref, *, eps):
    # out = x + relu(LN(x) @ W1 + b1) @ W2 + b2   (fused LN2 + FFN + residual)
    x = x_ref[...]
    y = _ln(x, g_ref[...], b_ref[...], eps)
    hdn = (
        jnp.dot(y.astype(w1_ref.dtype), w1_ref[...], preferred_element_type=jnp.float32)
        + b1_ref[...]
    )
    hdn = jnp.maximum(hdn, 0.0)
    o_ref[...] = (
        x
        + jnp.dot(hdn.astype(w2_ref.dtype), w2_ref[...],
                  preferred_element_type=jnp.float32)
        + b2_ref[...]
    )


def layernorm_kernel(x_ref, g_ref, b_ref, o_ref, *, eps):
    o_ref[...] = _ln(x_ref[...], g_ref[...], b_ref[...], eps)


# ----------------------------------- wrappers -----------------------------------

def _row_tile(m, target=_ROW_TILE_TARGET):
    """Row tile: full M if it fits, else target rounded down to a multiple of 8.
    Ragged last block handled by pl.cdiv grid + masked edge stores."""
    if m <= target:
        return m
    return max(8, (target // 8) * 8)


def _row_call(kernel, *, row_args, const_args, out_cols):
    """Run `kernel` tiled over the row (M) dimension of the 2-D row_args.

    row_args:   [M, *] f32 arrays, tiled tm rows per grid step.
    const_args: 2-D arrays (weights / biases / LN params) kept VMEM-resident
                via a constant index_map.
    """
    m = row_args[0].shape[0]
    tm = _row_tile(m)
    grid = (pl.cdiv(m, tm),)
    in_specs = (
        [pl.BlockSpec((tm, a.shape[1]), lambda i: (i, 0)) for a in row_args]
        + [pl.BlockSpec(a.shape, lambda i: (0, 0)) for a in const_args]
    )
    return pl.pallas_call(
        kernel,
        out_shape=jax.ShapeDtypeStruct((m, out_cols), jnp.float32),
        grid=grid,
        in_specs=in_specs,
        out_specs=pl.BlockSpec((tm, out_cols), lambda i: (i, 0)),
        compiler_params=pltpu.CompilerParams(
            dimension_semantics=("parallel",),
            vmem_limit_bytes=_VMEM_LIMIT,
        ),
    )(*row_args, *const_args)


def attention_layer(x, mask_add, lp, *, eps=_EPS):
    """x: [B, S, D] f32; mask_add: [B, 1, S] f32 additive mask.
    Returns x + MultiHeadAttn(LN1(x)) @ Wo + bo  (sublayer 0, dropout==identity)."""
    b, s, d = x.shape
    n_heads = lp["wqkv"].shape[0]
    dk = d // n_heads
    kernel = partial(attn_kernel, eps=eps, scale=1.0 / math.sqrt(dk),
                     bf16_exp=_BF16_EXP)
    return pl.pallas_call(
        kernel,
        out_shape=jax.ShapeDtypeStruct((b, s, d), jnp.float32),
        grid=(b, n_heads),
        in_specs=[
            pl.BlockSpec((1, s, d), lambda i, j: (i, 0, 0)),          # x
            pl.BlockSpec((1, 1, s), lambda i, j: (i, 0, 0)),          # additive mask
            pl.BlockSpec((1, d), lambda i, j: (0, 0)),                # ln1 gamma
            pl.BlockSpec((1, d), lambda i, j: (0, 0)),                # ln1 beta
            pl.BlockSpec((1, 3, d, dk), lambda i, j: (j, 0, 0, 0)),   # wqkv (head j)
            pl.BlockSpec((1, 3, 1, dk), lambda i, j: (j, 0, 0, 0)),   # bqkv (head j)
            pl.BlockSpec((1, dk, d), lambda i, j: (j, 0, 0)),         # wo   (head j)
            pl.BlockSpec((1, d), lambda i, j: (0, 0)),                # bo
        ],
        out_specs=pl.BlockSpec((1, s, d), lambda i, j: (i, 0, 0)),
        scratch_shapes=[
            pltpu.VMEM((s, d), _MM_DTYPE),     # LN(x) cached across heads
            pltpu.VMEM((s, d), jnp.float32),   # residual + attention accumulator
        ],
        compiler_params=pltpu.CompilerParams(
            dimension_semantics=("parallel", "arbitrary"),
            vmem_limit_bytes=_VMEM_LIMIT,
        ),
    )(x, mask_add, lp["ln1_g"], lp["ln1_b"], lp["wqkv"], lp["bqkv"],
      lp["wo"], lp["bo"])


def encoder_forward(x, mask, params):
    """Encoder.forward: x through N layers, then final LayerNorm.

    x: [B, S, D] f32; mask: [B, S] (1.0 attend / 0.0 masked, key-padding mask).
    """
    b, s, d = x.shape
    m = b * s

    # additive mask precomputed once: 0 where keep, -1e9 where masked
    mask_add = ((mask.astype(jnp.float32) - 1.0) * 1e9).reshape(b, 1, s)

    for lp in params["layers"]:
        # sublayer 0: x + self_attn(norm(x), mask)   (one fused pallas_call)
        x = attention_layer(x, mask_add, lp)
        # sublayer 1: x + feed_forward(norm(x))      (one fused pallas_call)
        x2 = _row_call(
            partial(ln_ffn_residual_kernel, eps=_EPS),
            row_args=[x.reshape(m, d)],
            const_args=[lp["ln2_g"], lp["ln2_b"], lp["w1"], lp["b1"],
                        lp["w2"], lp["b2"]],
            out_cols=d,
        )
        x = x2.reshape(b, s, d)

    # final LayerNorm
    out = _row_call(
        partial(layernorm_kernel, eps=_EPS),
        row_args=[x.reshape(m, d)],
        const_args=[params["norm_g"], params["norm_b"]],
        out_cols=d,
    )
    return out.reshape(b, s, d)


# ------------------------------ parameter init ----------------------------------

def init_params(key, n_layers, d_model, n_heads, d_ff):
    """Params in the kernel-friendly layout:
       - wqkv: [H, 3, D, dk] bf16 (per-head q/k/v column blocks, head-leading)
       - bqkv: [H, 3, 1, dk] f32
       - wo:   [H, dk, D]    bf16 (per-head row blocks of the output projection)
       - FFN weights bf16, biases / LN params f32, biases shaped [1, Dout].
    """
    dk = d_model // n_heads

    def lin_init(k, din, dout):
        kw, kb = jax.random.split(k)
        w = jax.random.normal(kw, (din, dout), jnp.float32) / math.sqrt(din)
        bias = 0.01 * jax.random.normal(kb, (dout,), jnp.float32)
        return w, bias

    def head_cols(w):  # [D, D] -> [H, D, dk] (column block h == head h)
        return w.reshape(d_model, n_heads, dk).transpose(1, 0, 2)

    params = {"h": n_heads, "layers": []}
    keys = jax.random.split(key, n_layers)
    for i in range(n_layers):
        lk = jax.random.split(keys[i], 6)
        wq, bq = lin_init(lk[0], d_model, d_model)
        wk, bk = lin_init(lk[1], d_model, d_model)
        wv, bv = lin_init(lk[2], d_model, d_model)
        wo, bo = lin_init(lk[3], d_model, d_model)
        w1, b1 = lin_init(lk[4], d_model, d_ff)
        w2, b2 = lin_init(lk[5], d_ff, d_model)

        wqkv = jnp.stack([head_cols(wq), head_cols(wk), head_cols(wv)], axis=1)
        bqkv = jnp.stack([bq.reshape(n_heads, dk), bk.reshape(n_heads, dk),
                          bv.reshape(n_heads, dk)], axis=1).reshape(n_heads, 3, 1, dk)

        layer = {
            "wqkv": wqkv.astype(_MM_DTYPE),                  # [H, 3, D, dk]
            "bqkv": bqkv,                                    # [H, 3, 1, dk] f32
            "wo": wo.reshape(n_heads, dk, d_model).astype(_MM_DTYPE),   # [H, dk, D]
            "bo": bo.reshape(1, d_model),
            "w1": w1.astype(_MM_DTYPE), "b1": b1.reshape(1, d_ff),
            "w2": w2.astype(_MM_DTYPE), "b2": b2.reshape(1, d_model),
            "ln1_g": jnp.ones((1, d_model), jnp.float32),
            "ln1_b": jnp.zeros((1, d_model), jnp.float32),
            "ln2_g": jnp.ones((1, d_model), jnp.float32),
            "ln2_b": jnp.zeros((1, d_model), jnp.float32),
        }
        params["layers"].append(layer)
    params["norm_g"] = jnp.ones((1, d_model), jnp.float32)
    params["norm_b"] = jnp.zeros((1, d_model), jnp.float32)
    return params


# ------------------------------------- main --------------------------------------

if __name__ == "__main__":
    B, S, D, H, Dff, N = 2, 8, 32, 4, 64, 2

    key = jax.random.PRNGKey(0)
    k_x, k_p = jax.random.split(key)
    x = jax.random.normal(k_x, (B, S, D), jnp.float32)
    # pad the last 2 tokens of batch 1
    mask = jnp.ones((B, S), jnp.float32).at[1, -2:].set(0.0)

    params = init_params(k_p, N, D, H, Dff)

    # TODO(synk): dropout inside the EncoderLayer sublayers is treated as identity (eval mode).
    out = jax.block_until_ready(encoder_forward(x, mask, params))
    assert out.shape == (B, S, D)
    assert bool(jnp.all(jnp.isfinite(out)))
    print("KERNEL_OK")
</pallas_src>

<mosaic_0001>
module attributes {stable_mosaic.version = 11 : i64} {
  func.func @attn_kernel(%arg0: i32, %arg1: i32, %arg2: memref<1x8x32xf32, #tpu.memory_space<vmem>>, %arg3: memref<1x1x8xf32, #tpu.memory_space<vmem>>, %arg4: memref<1x32xf32, #tpu.memory_space<vmem>>, %arg5: memref<1x32xf32, #tpu.memory_space<vmem>>, %arg6: memref<1x3x32x8xbf16, #tpu.memory_space<vmem>>, %arg7: memref<1x3x1x8xf32, #tpu.memory_space<vmem>>, %arg8: memref<1x8x32xbf16, #tpu.memory_space<vmem>>, %arg9: memref<1x32xf32, #tpu.memory_space<vmem>>, %arg10: memref<1x8x32xf32, #tpu.memory_space<vmem>>, %arg11: memref<8x32xbf16, #tpu.memory_space<vmem>>, %arg12: memref<8x32xf32, #tpu.memory_space<vmem>>) attributes {dimension_semantics = [#tpu.dimension_semantics<parallel>, #tpu.dimension_semantics<arbitrary>], iteration_bounds = array<i64: 2, 4>, scalar_prefetch = 0 : i64, scratch_operands = 2 : i64, tpu.core_type = #tpu.core_type<tc>, window_params = [{transform_indices = @transform_0, window_bounds = array<i64: 1, 8, 32>}, {transform_indices = @transform_1, window_bounds = array<i64: 1, 1, 8>}, {pipeline_mode = #tpu.pipeline_mode<synchronous>, transform_indices = @transform_2, window_bounds = array<i64: 1, 32>}, {pipeline_mode = #tpu.pipeline_mode<synchronous>, transform_indices = @transform_3, window_bounds = array<i64: 1, 32>}, {transform_indices = @transform_4, window_bounds = array<i64: 1, 3, 32, 8>}, {transform_indices = @transform_5, window_bounds = array<i64: 1, 3, 1, 8>}, {transform_indices = @transform_6, window_bounds = array<i64: 1, 8, 32>}, {pipeline_mode = #tpu.pipeline_mode<synchronous>, transform_indices = @transform_7, window_bounds = array<i64: 1, 32>}, {transform_indices = @transform_8, window_bounds = array<i64: 1, 8, 32>}]} {
    %c0_i32 = arith.constant 0 : i32
    %0 = arith.cmpi eq, %arg1, %c0_i32 : i32
    %1 = arith.extui %0 : i1 to i32
    %c0_i32_0 = arith.constant 0 : i32
    %2 = arith.cmpi ne, %1, %c0_i32_0 : i32
    scf.if %2 {
      %c0_43 = arith.constant 0 : index
      %c0_44 = arith.constant 0 : index
      %c0_45 = arith.constant 0 : index
      %59 = vector.load %arg2[%c0_43, %c0_44, %c0_45] : memref<1x8x32xf32, #tpu.memory_space<vmem>>, vector<1x8x32xf32>
      %60 = vector.shape_cast %59 : vector<1x8x32xf32> to vector<8x32xf32>
      %c0_46 = arith.constant 0 : index
      %c0_47 = arith.constant 0 : index
      %61 = vector.load %arg4[%c0_46, %c0_47] : memref<1x32xf32, #tpu.memory_space<vmem>>, vector<1x32xf32>
      %c0_48 = arith.constant 0 : index
      %c0_49 = arith.constant 0 : index
      %62 = vector.load %arg5[%c0_48, %c0_49] : memref<1x32xf32, #tpu.memory_space<vmem>>, vector<1x32xf32>
      %cst_50 = arith.constant dense<0.000000e+00> : vector<8xf32>
      %63 = vector.multi_reduction <add>, %60, %cst_50 [1] : vector<8x32xf32> to vector<8xf32>
      %64 = vector.shape_cast %63 : vector<8xf32> to vector<8x1xf32>
      %cst_51 = arith.constant 3.200000e+01 : f32
      %65 = vector.broadcast %cst_51 : f32 to vector<8x1xf32>
      %66 = arith.divf %64, %65 : vector<8x1xf32>
      %67 = vector.broadcast %66 : vector<8x1xf32> to vector<8x32xf32>
      %68 = arith.subf %60, %67 : vector<8x32xf32>
      %69 = arith.mulf %68, %68 : vector<8x32xf32>
      %cst_52 = arith.constant dense<0.000000e+00> : vector<8xf32>
      %70 = vector.multi_reduction <add>, %69, %cst_52 [1] : vector<8x32xf32> to vector<8xf32>
      %71 = vector.shape_cast %70 : vector<8xf32> to vector<8x1xf32>
      %cst_53 = arith.constant 3.100000e+01 : f32
      %72 = vector.broadcast %cst_53 : f32 to vector<8x1xf32>
      %73 = arith.divf %71, %72 : vector<8x1xf32>
      %74 = math.sqrt %73 : vector<8x1xf32>
      %75 = vector.broadcast %61 : vector<1x32xf32> to vector<8x32xf32>
      %76 = arith.mulf %75, %68 : vector<8x32xf32>
      %cst_54 = arith.constant 9.99999997E-7 : f32
      %77 = vector.broadcast %cst_54 : f32 to vector<8x1xf32>
      %78 = arith.addf %74, %77 : vector<8x1xf32>
      %79 = vector.broadcast %78 : vector<8x1xf32> to vector<8x32xf32>
      %80 = arith.divf %76, %79 : vector<8x32xf32>
      %81 = vector.broadcast %62 : vector<1x32xf32> to vector<8x32xf32>
      %82 = arith.addf %80, %81 : vector<8x32xf32>
      %83 = arith.truncf %82 : vector<8x32xf32> to vector<8x32xbf16>
      %c0_55 = arith.constant 0 : index
      %c0_56 = arith.constant 0 : index
      %84 = vector.load %arg11[%c0_55, %c0_56] : memref<8x32xbf16, #tpu.memory_space<vmem>>, vector<8x32xbf16>
      tpu.vector_store %arg11[%c0_55, %c0_56], %83 {strides = array<i32>} : memref<8x32xbf16, #tpu.memory_space<vmem>>, vector<8x32xbf16>,
      %c0_57 = arith.constant 0 : index
      %c0_58 = arith.constant 0 : index
      %c0_59 = arith.constant 0 : index
      %85 = vector.load %arg2[%c0_57, %c0_58, %c0_59] : memref<1x8x32xf32, #tpu.memory_space<vmem>>, vector<1x8x32xf32>
      %86 = vector.shape_cast %85 : vector<1x8x32xf32> to vector<8x32xf32>
      %c0_60 = arith.constant 0 : index
      %c0_61 = arith.constant 0 : index
      %87 = vector.load %arg9[%c0_60, %c0_61] : memref<1x32xf32, #tpu.memory_space<vmem>>, vector<1x32xf32>
      %88 = vector.broadcast %87 : vector<1x32xf32> to vector<8x32xf32>
      %89 = arith.addf %86, %88 : vector<8x32xf32>
      %c0_62 = arith.constant 0 : index
      %c0_63 = arith.constant 0 : index
      %90 = vector.load %arg12[%c0_62, %c0_63] : memref<8x32xf32, #tpu.memory_space<vmem>>, vector<8x32xf32>
      tpu.vector_store %arg12[%c0_62, %c0_63], %89 {strides = array<i32>} : memref<8x32xf32, #tpu.memory_space<vmem>>, vector<8x32xf32>,
    } else {
    }
    %c0 = arith.constant 0 : index
    %c0_1 = arith.constant 0 : index
    %3 = vector.load %arg11[%c0, %c0_1] : memref<8x32xbf16, #tpu.memory_space<vmem>>, vector<8x32xbf16>
    %c0_2 = arith.constant 0 : index
    %c0_3 = arith.constant 0 : index
    %c0_4 = arith.constant 0 : index
    %c0_5 = arith.constant 0 : index
    %4 = vector.load %arg7[%c0_2, %c0_3, %c0_4, %c0_5] : memref<1x3x1x8xf32, #tpu.memory_space<vmem>>, vector<1x1x1x8xf32>
    %5 = vector.shape_cast %4 : vector<1x1x1x8xf32> to vector<1x8xf32>
    %c0_6 = arith.constant 0 : index
    %c1 = arith.constant 1 : index
    %c0_7 = arith.constant 0 : index
    %c0_8 = arith.constant 0 : index
    %6 = vector.load %arg7[%c0_6, %c1, %c0_7, %c0_8] : memref<1x3x1x8xf32, #tpu.memory_space<vmem>>, vector<1x1x1x8xf32>
    %7 = vector.shape_cast %6 : vector<1x1x1x8xf32> to vector<1x8xf32>
    %c0_9 = arith.constant 0 : index
    %c2 = arith.constant 2 : index
    %c0_10 = arith.constant 0 : index
    %c0_11 = arith.constant 0 : index
    %8 = vector.load %arg7[%c0_9, %c2, %c0_10, %c0_11] : memref<1x3x1x8xf32, #tpu.memory_space<vmem>>, vector<1x1x1x8xf32>
    %9 = vector.shape_cast %8 : vector<1x1x1x8xf32> to vector<1x8xf32>
    %c0_12 = arith.constant 0 : index
    %c0_13 = arith.constant 0 : index
    %c0_14 = arith.constant 0 : index
    %c0_15 = arith.constant 0 : index
    %10 = vector.load %arg6[%c0_12, %c0_13, %c0_14, %c0_15] : memref<1x3x32x8xbf16, #tpu.memory_space<vmem>>, vector<1x1x32x8xbf16>
    %11 = vector.shape_cast %10 : vector<1x1x32x8xbf16> to vector<32x8xbf16>
    %cst = arith.constant dense<0.000000e+00> : vector<8x8xf32>
    %12 = tpu.matmul %3, %11, %cst {dimension_numbers = #tpu.dot_dimension_numbers<[1], [0], [0], [1], [0, 0, 1, 1], [], []>} : vector<8x32xbf16>, vector<32x8xbf16>, vector<8x8xf32> -> vector<8x8xf32>
    %13 = vector.broadcast %5 : vector<1x8xf32> to vector<8x8xf32>
    %14 = arith.addf %12, %13 : vector<8x8xf32>
    %c0_16 = arith.constant 0 : index
    %c1_17 = arith.constant 1 : index
    %c0_18 = arith.constant 0 : index
    %c0_19 = arith.constant 0 : index
    %15 = vector.load %arg6[%c0_16, %c1_17, %c0_18, %c0_19] : memref<1x3x32x8xbf16, #tpu.memory_space<vmem>>, vector<1x1x32x8xbf16>
    %16 = vector.shape_cast %15 : vector<1x1x32x8xbf16> to vector<32x8xbf16>
    %cst_20 = arith.constant dense<0.000000e+00> : vector<8x8xf32>
    %17 = tpu.matmul %3, %16, %cst_20 {dimension_numbers = #tpu.dot_dimension_numbers<[1], [0], [0], [1], [0, 0, 1, 1], [], []>} : vector<8x32xbf16>, vector<32x8xbf16>, vector<8x8xf32> -> vector<8x8xf32>
    %18 = vector.broadcast %7 : vector<1x8xf32> to vector<8x8xf32>
    %19 = arith.addf %17, %18 : vector<8x8xf32>
    %c0_21 = arith.constant 0 : index
    %c2_22 = arith.constant 2 : index
    %c0_23 = arith.constant 0 : index
    %c0_24 = arith.constant 0 : index
    %20 = vector.load %arg6[%c0_21, %c2_22, %c0_23, %c0_24] : memref<1x3x32x8xbf16, #tpu.memory_space<vmem>>, vector<1x1x32x8xbf16>
    %21 = vector.shape_cast %20 : vector<1x1x32x8xbf16> to vector<32x8xbf16>
    %cst_25 = arith.constant dense<0.000000e+00> : vector<8x8xf32>
    %22 = tpu.matmul %3, %21, %cst_25 {dimension_numbers = #tpu.dot_dimension_numbers<[1], [0], [0], [1], [0, 0, 1, 1], [], []>} : vector<8x32xbf16>, vector<32x8xbf16>, vector<8x8xf32> -> vector<8x8xf32>
    %23 = vector.broadcast %9 : vector<1x8xf32> to vector<8x8xf32>
    %24 = arith.addf %22, %23 : vector<8x8xf32>
    %cst_26 = arith.constant 0.353553385 : f32
    %25 = vector.broadcast %cst_26 : f32 to vector<8x8xf32>
    %26 = arith.mulf %14, %25 : vector<8x8xf32>
    %27 = arith.truncf %26 : vector<8x8xf32> to vector<8x8xbf16>
    %28 = arith.truncf %19 : vector<8x8xf32> to vector<8x8xbf16>
    %cst_27 = arith.constant dense<0.000000e+00> : vector<8x8xf32>
    %29 = tpu.matmul %27, %28, %cst_27 {dimension_numbers = #tpu.dot_dimension_numbers<[1], [1], [0], [0], [0, 0, 1, 0], [], []>} : vector<8x8xbf16>, vector<8x8xbf16>, vector<8x8xf32> -> vector<8x8xf32>
    %c0_28 = arith.constant 0 : index
    %c0_29 = arith.constant 0 : index
    %c0_30 = arith.constant 0 : index
    %30 = vector.load %arg3[%c0_28, %c0_29, %c0_30] : memref<1x1x8xf32, #tpu.memory_space<vmem>>, vector<1x1x8xf32>
    %31 = vector.shape_cast %30 : vector<1x1x8xf32> to vector<1x8xf32>
    %32 = vector.broadcast %31 : vector<1x8xf32> to vector<8x8xf32>
    %33 = arith.addf %29, %32 : vector<8x8xf32>
    %cst_31 = arith.constant dense<0xFF800000> : vector<8xf32>
    %34 = vector.multi_reduction <maximumf>, %33, %cst_31 [1] : vector<8x8xf32> to vector<8xf32>
    %35 = vector.shape_cast %34 : vector<8xf32> to vector<8x1xf32>
    %36 = vector.broadcast %35 : vector<8x1xf32> to vector<8x8xf32>
    %37 = arith.subf %33, %36 : vector<8x8xf32>
    %38 = arith.truncf %37 : vector<8x8xf32> to vector<8x8xbf16>
    %39 = math.exp %38 : vector<8x8xbf16>
    %40 = arith.extf %39 : vector<8x8xbf16> to vector<8x8xf32>
    %cst_32 = arith.constant dense<0.000000e+00> : vector<8xf32>
    %41 = vector.multi_reduction <add>, %40, %cst_32 [1] : vector<8x8xf32> to vector<8xf32>
    %42 = vector.shape_cast %41 : vector<8xf32> to vector<8x1xf32>
    %43 = tpu.reciprocal %42 {approx = true} : vector<8x1xf32> -> vector<8x1xf32>
    %44 = vector.broadcast %43 : vector<8x1xf32> to vector<8x8xf32>
    %45 = arith.mulf %40, %44 : vector<8x8xf32>
    %46 = arith.truncf %45 : vector<8x8xf32> to vector<8x8xbf16>
    %47 = arith.truncf %24 : vector<8x8xf32> to vector<8x8xbf16>
    %cst_33 = arith.constant dense<0.000000e+00> : vector<8x8xf32>
    %48 = tpu.matmul %46, %47, %cst_33 {dimension_numbers = #tpu.dot_dimension_numbers<[1], [0], [0], [1], [0, 0, 1, 1], [], []>} : vector<8x8xbf16>, vector<8x8xbf16>, vector<8x8xf32> -> vector<8x8xf32>
    %c0_34 = arith.constant 0 : index
    %c0_35 = arith.constant 0 : index
    %49 = vector.load %arg12[%c0_34, %c0_35] : memref<8x32xf32, #tpu.memory_space<vmem>>, vector<8x32xf32>
    %50 = arith.truncf %48 : vector<8x8xf32> to vector<8x8xbf16>
    %c0_36 = arith.constant 0 : index
    %c0_37 = arith.constant 0 : index
    %c0_38 = arith.constant 0 : index
    %51 = vector.load %arg8[%c0_36, %c0_37, %c0_38] : memref<1x8x32xbf16, #tpu.memory_space<vmem>>, vector<1x8x32xbf16>
    %52 = vector.shape_cast %51 : vector<1x8x32xbf16> to vector<8x32xbf16>
    %cst_39 = arith.constant dense<0.000000e+00> : vector<8x32xf32>
    %53 = tpu.matmul %50, %52, %cst_39 {dimension_numbers = #tpu.dot_dimension_numbers<[1], [0], [0], [1], [0, 0, 1, 1], [], []>} : vector<8x8xbf16>, vector<8x32xbf16>, vector<8x32xf32> -> vector<8x32xf32>
    %54 = arith.addf %49, %53 : vector<8x32xf32>
    %c0_40 = arith.constant 0 : index
    %c0_41 = arith.constant 0 : index
    %55 = vector.load %arg12[%c0_40, %c0_41] : memref<8x32xf32, #tpu.memory_space<vmem>>, vector<8x32xf32>
    tpu.vector_store %arg12[%c0_40, %c0_41], %54 {strides = array<i32>} : memref<8x32xf32, #tpu.memory_space<vmem>>, vector<8x32xf32>,
    %c3_i32 = arith.constant 3 : i32
    %56 = arith.cmpi eq, %arg1, %c3_i32 : i32
    %57 = arith.extui %56 : i1 to i32
    %c0_i32_42 = arith.constant 0 : i32
    %58 = arith.cmpi ne, %57, %c0_i32_42 : i32
    scf.if %58 {
      %c0_43 = arith.constant 0 : index
      %c0_44 = arith.constant 0 : index
      %59 = vector.load %arg12[%c0_43, %c0_44] : memref<8x32xf32, #tpu.memory_space<vmem>>, vector<8x32xf32>
      %c0_45 = arith.constant 0 : index
      %c0_46 = arith.constant 0 : index
      %c0_47 = arith.constant 0 : index
      %60 = vector.load %arg10[%c0_45, %c0_46, %c0_47] : memref<1x8x32xf32, #tpu.memory_space<vmem>>, vector<1x8x32xf32>
      %61 = vector.shape_cast %60 : vector<1x8x32xf32> to vector<8x32xf32>
      %62 = vector.shape_cast %59 : vector<8x32xf32> to vector<1x8x32xf32>
      tpu.vector_store %arg10[%c0_45, %c0_46, %c0_47], %62 {strides = array<i32>} : memref<1x8x32xf32, #tpu.memory_space<vmem>>, vector<1x8x32xf32>,
    } else {
    }
    return
  }
  func.func @transform_0(%arg0: i32, %arg1: i32) -> (i32, i32, i32) {
    %c0_i32 = arith.constant 0 : i32
    %c0_i32_0 = arith.constant 0 : i32
    %c0_i32_1 = arith.constant 0 : i32
    return %arg0, %c0_i32, %c0_i32_0 : i32, i32, i32
  }
  func.func @transform_1(%arg0: i32, %arg1: i32) -> (i32, i32, i32) {
    %c0_i32 = arith.constant 0 : i32
    %c0_i32_0 = arith.constant 0 : i32
    %c0_i32_1 = arith.constant 0 : i32
    return %arg0, %c0_i32, %c0_i32_0 : i32, i32, i32
  }
  func.func @transform_2(%arg0: i32, %arg1: i32) -> (i32, i32) {
    %c0_i32 = arith.constant 0 : i32
    %c0_i32_0 = arith.constant 0 : i32
    %c0_i32_1 = arith.constant 0 : i32
    return %c0_i32, %c0_i32_0 : i32, i32
  }
  func.func @transform_3(%arg0: i32, %arg1: i32) -> (i32, i32) {
    %c0_i32 = arith.constant 0 : i32
    %c0_i32_0 = arith.constant 0 : i32
    %c0_i32_1 = arith.constant 0 : i32
    return %c0_i32, %c0_i32_0 : i32, i32
  }
  func.func @transform_4(%arg0: i32, %arg1: i32) -> (i32, i32, i32, i32) {
    %c0_i32 = arith.constant 0 : i32
    %c0_i32_0 = arith.constant 0 : i32
    %c0_i32_1 = arith.constant 0 : i32
    %c0_i32_2 = arith.constant 0 : i32
    return %arg1, %c0_i32, %c0_i32_0, %c0_i32_1 : i32, i32, i32, i32
  }
  func.func @transform_5(%arg0: i32, %arg1: i32) -> (i32, i32, i32, i32) {
    %c0_i32 = arith.constant 0 : i32
    %c0_i32_0 = arith.constant 0 : i32
    %c0_i32_1 = arith.constant 0 : i32
    %c0_i32_2 = arith.constant 0 : i32
    return %arg1, %c0_i32, %c0_i32_0, %c0_i32_1 : i32, i32, i32, i32
  }
  func.func @transform_6(%arg0: i32, %arg1: i32) -> (i32, i32, i32) {
    %c0_i32 = arith.constant 0 : i32
    %c0_i32_0 = arith.constant 0 : i32
    %c0_i32_1 = arith.constant 0 : i32
    return %arg1, %c0_i32, %c0_i32_0 : i32, i32, i32
  }
  func.func @transform_7(%arg0: i32, %arg1: i32) -> (i32, i32) {
    %c0_i32 = arith.constant 0 : i32
    %c0_i32_0 = arith.constant 0 : i32
    %c0_i32_1 = arith.constant 0 : i32
    return %c0_i32, %c0_i32_0 : i32, i32
  }
  func.func @transform_8(%arg0: i32, %arg1: i32) -> (i32, i32, i32) {
    %c0_i32 = arith.constant 0 : i32
    %c0_i32_0 = arith.constant 0 : i32
    %c0_i32_1 = arith.constant 0 : i32
    return %arg0, %c0_i32, %c0_i32_0 : i32, i32, i32
  }
}

</mosaic_0001>

<bundles_post_ra>
// kernel: tpu_custom_call.1
= control target key start
LH: loop header
LB: loop body
LE: loop exit
PB: predicated region body
PF: predicated region fallthrough
CT: control target
= control target key end

     0   :  { %s1472_s0 = inlined_call_operand.vmem [shape: f32[2,8,32], index: 0, kind: input, shape index: {}]   ;;  %s1473_s1 = inlined_call_operand.vmem [shape: f32[2,1,8], index: 1, kind: input, shape index: {}]   ;;  %s1474_s2 = inlined_call_operand.vmem [shape: f32[1,32], index: 2, kind: input, shape index: {}]   ;;  %s1475_s3 = inlined_call_operand.vmem [shape: f32[1,32], index: 3, kind: input, shape index: {}]   ;;  %s1476_s4 = inlined_call_operand.vmem [shape: bf16[4,3,32,8], index: 4, kind: input, shape index: {}]   ;;  %s1477_s5 = inlined_call_operand.vmem [shape: f32[4,3,1,8], index: 5, kind: input, shape index: {}]   ;;  %s1478_s6 = inlined_call_operand.vmem [shape: bf16[4,8,32], index: 6, kind: input, shape index: {}]   ;;  %s1479_s7 = inlined_call_operand.vmem [shape: f32[1,32], index: 7, kind: input, shape index: {}]   ;;  %s1480_s8 = inlined_call_operand.hbm [shape: f32[2,8,32], index: 8, kind: output, shape index: {}]  }
   0x1   :  { %1493 = sst [smem:[#allocation17_spill]] %s1480_s8 }
   0x2   :  { %13 = vsyncpa [#allocation5], 0 }
   0x3   :  { %15 = vsyncpa [#allocation5 + $0x1], 0  ;;  %s1275_s27 = smov 0   ;;  %s1277_s28 = smov 0  }
   0x4   :  { %s1279_s29 = smov 0   ;;  %s1281_s30 = smov 0  }
   0x5   :  { %s1283_s9 = smov 0   ;;  %s1285_s10 = smov 0  }
   0x6   :  { %s1287_s11 = smov 0   ;;  %s1289_s12 = smov 0  }
   0x7 LB: > { %1494 = sst [smem:[#allocation7_spill]] %s1197_s27  ;;  %s943_s13 = sadd.s32 4294967295, %s1225_s12   ;;  %s1225_s12 = sphi %s1289_s12, %s21_s12   ;;  %s1221_s11 = sphi %s1287_s11, %s1517_s11   ;;  %s1217_s10 = sphi %s1285_s10, %s1516_s10   ;;  %s1213_s9 = sphi %s1283_s9, %s1515_s9   ;;  %s1209_s30 = sphi %s1281_s30, %s1514_s30   ;;  %s1205_s29 = sphi %s1279_s29, %s1513_s29   ;;  %s1201_s28 = sphi %s1277_s28, %s1519_s28   ;;  %s1197_s27 = sphi %s1275_s27, %s1518_s27  }
   0x8   : > { %1495 = sst [smem:[#allocation8_spill]] %s1205_s29  ;;  %s944_s14 = sadd.s32 4294967294, %s1225_s12  }
   0x9   : > { %1496 = sst [smem:[#allocation9_spill]] %s1217_s10  ;;  %s30_s15 = sadd.s32 1, %s1217_s10 }
   0xa   : > { %1497 = sst [smem:[#allocation10_spill]] %s1221_s11  ;;  %p31_p0 = scmp.ge.s32.totalorder %s30_s15, 4 }
   0xb   : > { %1498 = sst [smem:[#allocation11_spill]] %s1225_s12  ;;  %s33_s16 = sadd.s32 1, %s1221_s11 }
   0xc   : > { %p243_p1 = scmp.ne.s32.totalorder %s1205_s29, %s1201_s28  ;;  %p244_p2 = scmp.eq.s32.totalorder %s943_s13, 7 }
   0xd   : > { %s1521_s15 = smov (%p31_p0, %s30_s15), 0  ;;  %s1523_s16 = smov (!%p31_p0, %s33_s16), %s1221_s11 }
   0xe   : > { %1499 = sst [smem:[#allocation12_spill]] %s1521_s15  ;;  %p1324_p3 = por %p244_p2, %p243_p1 }
   0xf   : > { %p249_p4 = scmp.ne.s32.totalorder %s1201_s28, %s1197_s27  ;;  %p35_p5 = scmp.ge.s32.totalorder %s1523_s16, 2 }
  0x10   : > { %s1500_s17 = scalar_select %p1324_p3, 1, 0 }
  0x11   : > { %p250_p6 = scmp.eq.s32.totalorder %s944_s14, 7  ;;  %p947_p7 = scmp.ge.s32.totalorder %s1225_s12, 1 }
  0x12   : > { %1501 = sst [smem:[#allocation13_spill]] %s1500_s17  ;;  %p312_p8 = scmp.lt.s32.totalorder %s1225_s12, 9 }
  0x13   : > { %s1525_s16 = smov (%p35_p5, %s1523_s16), 0  ;;  %p1334_p9 = por %p250_p6, %p249_p4 }
  0x14   : > { %1502 = sst [smem:[#allocation14_spill]] %s1525_s16  ;;  %p313_p10 = pnand %p947_p7, %p312_p8 }
  0x15   : > { %s1503_s18 = scalar_select %p1334_p9, 1, 0 }
  0x16   : > { %s230_s19 = ssub.s32 %s1221_s11, %s1525_s16  ;;  %s233_s20 = sadd.s32 1, %s1205_s29 }
  0x17   : > { %1504 = sst [smem:[#allocation15_spill]] %s1503_s18  ;;  %p231_p11 = scmp.eq.s32.totalorder %s230_s19, 0 }
  0x18   : > { %316 = sbr.rel (%p313_p10) target bundleno = 1520 (0x5f0), region = 52  ;;  %s1484_s22 = sand.u32 (!%p313_p10), 1, %s1201_s28  }
  0x19   : > { %s1342_s21 = scalar_select %p231_p11, %s1205_s29, %s233_s20  }
  0x1a   : > { %p361_p12 = scmp.lt.s32.totalorder (!%p313_p10), %s1213_s9, 1  ;;  %s1348_s23 = sshll.u32 (!%p313_p10), %s1484_s22, 3 }
  0x1b   : > { %1505 = sst [smem:[#allocation16_spill]] %s1342_s21  ;;  %p368_p13 = scmp.lt.s32.totalorder (!%p313_p10), %s1209_s30, 3 }
  0x1c   : > { %s360_s16 = scalar_lea.vmem (!%p313_p10), [#allocation4], %s1348_s23  ;;  %p952_p0 = scmp.ne.s32.totalorder (!%p313_p10), %s1209_s30, 0 }
  0x1d   : > { %s1352_s24 = scalar_select %p361_p12, %s1213_s9, 1 }
  0x1e   : > { %s369_s25 = scalar_select %p368_p13, %s1209_s30, 3 }
  0x1f   : > { %s949_s26 = sshll.u32 %s1352_s24, 3  ;;  %s367_s19 = scalar_lea.vmem %s1473_s1, %s1352_s24 }
  0x20   : > { %s364_s15 = scalar_lea.vmem %s1472_s0, %s949_s26  ;;  %s1044_s11 = smul.u32 48, %s369_s25 }
  0x21   : > { %s1045_s10 = smul.u32 3, %s369_s25  ;;  %s951_s22 = sshll.u32 %s369_s25, 2 }
  0x22   : > { %s1366_s18 = scalar_lea.vmem %s1476_s4, %s1044_s11  ;;  %s1371_s8 = scalar_lea.vmem %s1478_s6, %s951_s22 }
  0x23   : > { %s1376_s14 = scalar_lea.vmem %s1477_s5, %s1045_s10  ;;  %385 = sbr.rel (%p952_p0) target bundleno = 368 (0x170), region = 56 }
  0x28   : > { %v386_v0 = vld [vmem:[%s364_s15] sm:$0xff]  ;;  %vm389_vm0 = vcmask 261120   ;;  %vm427_vm3 = vcmask 257024  }
  0x29   : > { %v955_v1 = vld [vmem:[%s1479_s7] ss:$0 sm:$0xff]  ;;  %v390_v2 = vsel %vm389_vm0, %v386_v0, 0.0 }
  0x2a   : > { %v437_v3 = vadd.f32 %v955_v1, %v386_v0  ;;  %391 = vadd.xlane.f32.xlu0 %v390_v2  ;;  %v953_v17 = vld [vmem:[%s1474_s2] ss:$0 sm:$0xff] }
  0x2b   : > { %v954_v20 = vld [vmem:[%s1475_s3] ss:$0 sm:$0xff] }
  0x2c   : > { %438 = vst.msk [vmem:[#allocation3] sm:$0xff] %vm389_vm0, %v437_v3 }
  0xb3   : > { %v392_v4 = vpop.xlane.xlu0 %391 }
  0xb4   : > { %v394_v5 = vmul.f32 0.03125, %v392_v4 }
  0xb6   : > { %v395_v6 = vsub.f32 %v386_v0, %v394_v5 }
  0xb8   : > { %v396_v7 = vmul.f32 %v395_v6, %v395_v6  ;;  %v415_v18 = vmul.f32 %v953_v17, %v395_v6 }
  0xba   : > { %v397_v8 = vsel %vm389_vm0, %v396_v7, 0.0 }
  0xbb   : > { %398 = vadd.xlane.f32.xlu0 %v397_v8 }
 0x144   : > { %v399_v9 = vpop.xlane.xlu0 %398 }
 0x145   : > { %v401_v10 = vmul.f32 0.032258064, %v399_v9 }
 0x147   : > { %1119 = vrsqrt.f32 %v401_v10  ;;  %vm404_vm1 = vcmp.eq.f32.partialorder %v401_v10, inf  ;;  %v407_v13 = vand.u32 2147483648, %v401_v10  ;;  %vm406_vm2 = vcmp.eq.f32.partialorder %v401_v10, 0.0 }
 0x154   : > { %v1120_v11 = vpop.eup %1119 }
 0x155   : > { %v403_v12 = vmul.f32 %v1120_v11, %v401_v10 }
 0x157   : > { %v405_v14 = vsel %vm404_vm1, %v401_v10, %v403_v12 }
 0x158   : > { %v408_v15 = vsel %vm406_vm2, %v407_v13, %v405_v14 }
 0x159   : > { %v416_v16 = vadd.f32 1e-06, %v408_v15 }
 0x15b   : > { %1121 = vrcp.f32 %v416_v16 }
 0x168   : > { %v1122_v19 = vpop.eup %1121 }
 0x169   : > { %v418_v21 = vmul.f32 %v1122_v19, %v415_v18 }
 0x16b   : > { %v425_v22 = vadd.f32 %v954_v20, %v418_v21 }
 0x16d   : > { %v426_v23 = vpack.c.bf16 %v425_v22, %v425_v22 }
 0x16f   : > { %428 = vst.msk [vmem:[#allocation2] sm:$0xf] %vm427_vm3, %v426_v23 }
 0x170 PF: > { %v1123_v24 = vld [vmem:[%s1366_s18 + $0x18] sm:$0xff]   ;;  %v1227_v25 = vmov 0.0   ;;  %v1124_v26 = vld [vmem:[%s1366_s18 + $0x8] sm:$0xff]   ;;  %v1125_v27 = vld [vmem:[%s1366_s18 + $0x10] sm:$0xff]   ;;  %vm1228_vm4 = vmmov 0   ;;  %vm467_vm5 = vcmask 261120  }
 0x171   : > { %1010 = vmatprep.subr.bf16.mxu1 %v1227_v25  ;;  %1002 = vmatprep.subr.bf16.mxu0 %v1227_v25  ;;  %v1126_v28 = vld [vmem:[%s1366_s18] sm:$0xff]   ;;  %vm647_vm6 = vcmask 64512   ;;  %v1127_v46 = vld [vmem:[%s1366_s18 + $0x28] sm:$0xff]   ;;  %vm713_vm7 = vcmask 1043456   ;;  %p982_p1 = scmp.ne.s32.totalorder %s1209_s30, 3 }
 0x172   : > { %1011 = vmatpush3.bf16.msra.mxu1 %v1123_v24  ;;  %1014 = vmatprep.mubr.msk.bf16.mxu1 %vm1228_vm4, %v1227_v25  ;;  %v966_v30 = vld [vmem:[%s1376_s14 + $0x1] ss:$0 sm:$0xff]  ;;  %v958_v31 = vld [vmem:[%s1376_s14] ss:$0 sm:$0xff]  ;;  %v974_v62 = vld [vmem:[%s1376_s14 + $0x2] ss:$0 sm:$0xff] }
 0x173   : > { %1003 = vmatpush3.bf16.msra.mxu0 %v1124_v26  ;;  %1012 = vmatprep.subr.bf16.mxu1 %v1227_v25  ;;  %v1128_v47 = vld [vmem:[%s1366_s18 + $0x20] sm:$0xff]  }
 0x174   : > { %1004 = vmatprep.subr.bf16.mxu0 %v1227_v25  ;;  %1006 = vmatprep.mubr.msk.bf16.mxu0 %vm1228_vm4, %v1227_v25  ;;  %v978_v48 = vld [vmem:[%s367_s19] ss:$0 sm:$0xff]  ;;  %v757_v17 = vld [vmem:[#allocation3] sm:$0xff] }
 0x175   : > { %v759_v6 = vld [vmem:[%s1371_s8] sm:$0xf] }
 0x176   : > { %1013 = vmatpush3.bf16.msra.mxu1 %v1125_v27  ;;  %v439_v29 = vld [vmem:[#allocation2] sm:$0xf]  ;;  %v764_v7 = vsel %vm713_vm7, %v759_v6, 0 }
 0x177   : > { %1005 = vmatpush3.bf16.msra.mxu0 %v1126_v28  ;;  %1026 = vmatprep.subr.bf16.mxu1 %v1227_v25 }
 0x178   : > { %1018 = vmatprep.subr.bf16.mxu0 %v1227_v25 }
 0x179   : > { %1015 = vmatmul.mubr.msk.bf16.vlgmr.msra.gmra.mxu1 %vm467_vm5, %v439_v29 }
 0x17a   : > { %1007 = vmatmul.mubr.msk.bf16.vlgmr.msra.gmra.mxu0 %vm467_vm5, %v439_v29  ;;  %1028 = vmatprep.mubr.msk.bf16.mxu1 %vm1228_vm4, %v1227_v25 }
 0x17b   : > { %1022 = vmatprep.mubr.msk.bf16.mxu0 %vm1228_vm4, %v1227_v25  ;;  %1019 = vmatpush3.bf16.msra.mxu0 %v1127_v46 }
 0x17c   : > { %1020 = vmatprep.subr.bf16.mxu0 %v1227_v25 }
 0x17f   : > { %1021 = vmatpush3.bf16.msra.mxu0 %v1128_v47 }
 0x180   : > { %1032 = vmatprep.subr.bf16.mxu0 %v1227_v25 }
 0x182   : > { %1023 = vmatmul.mubr.msk.bf16.vlgmr.msra.gmra.mxu0 %vm467_vm5, %v439_v29 }
 0x183   : > { %1034 = vmatprep.mubr.msk.bf16.mxu0 %vm1228_vm4, %v1227_v25 }
 0x239   : > { %v568_v32 = vpop.f32.mrf.mxu1 }
 0x23a   : > { %v569_v33 = vadd.f32 %v966_v30, %v568_v32  ;;  %v505_v34 = vpop.f32.mrf.mxu0 }
 0x23b   : > { %v506_v35 = vadd.f32 %v958_v31, %v505_v34  ;;  %v1016_v36 = vpop.f32.mrf.mxu1 }
 0x23c   : > { %v639_v37 = vpack.c.bf16 %v569_v33, %v569_v33  ;;  %v1008_v38 = vpop.f32.mrf.mxu0 }
 0x23d   : > { %v571_v39 = vpop.f32.mrf.mxu1  ;;  %v637_v41 = vmul.f32 0.35355338, %v506_v35 }
 0x23e   : > { %v652_v40 = vsel %vm647_vm6, %v639_v37, 0  ;;  %v508_v42 = vpop.f32.mrf.mxu0 }
 0x23f   : > { %v1017_v43 = vpop.f32.mrf.mxu1  ;;  %1027 = vmatpush3.bf16.xpose.msra.mxu1 %v652_v40  ;;  %v638_v45 = vpack.c.bf16 %v637_v41, %v637_v41 }
 0x240   : > { %v1009_v44 = vpop.f32.mrf.mxu0  ;;  %1038 = vmatprep.subr.bf16.mxu1 %v1227_v25 }
 0x242   : > { %v631_v63 = vpop.f32.mrf.mxu0 }
 0x243   : > { %v632_v0 = vadd.f32 %v974_v62, %v631_v63 }
 0x244   : > { %v1024_v1 = vpop.f32.mrf.mxu0 }
 0x245   : > { %v709_v2 = vpack.c.bf16 %v632_v0, %v632_v0 }
 0x246   : > { %1029 = vmatmul.mubr.msk.bf16.vlgmr.msra.gmra.mxu1 %vm647_vm6, %v638_v45  ;;  %v634_v3 = vpop.f32.mrf.mxu0 }
 0x247   : > { %1040 = vmatprep.mubr.msk.bf16.mxu1 %vm1228_vm4, %v1227_v25  ;;  %v715_v4 = vsel %vm713_vm7, %v709_v2, 0  ;;  %1039 = vmatpush3.bf16.msra.mxu1 %v764_v7 }
 0x248   : > { %v1025_v5 = vpop.f32.mrf.mxu0  ;;  %1033 = vmatpush3.bf16.msra.mxu0 %v715_v4 }
 0x306   : > { %v688_v49 = vpop.f32.mrf.mxu1 }
 0x307   : > { %v689_v50 = vadd.f32 %v978_v48, %v688_v49 }
 0x308   : > { %v1030_v51 = vpop.f32.mrf.mxu1 }
 0x309   : > { %v694_v52 = vsel %vm647_vm6, %v689_v50, -inf }
 0x30a   : > { %695 = vmax.xlane.f32.xlu0 %v694_v52  ;;  %v691_v53 = vpop.f32.mrf.mxu1 }
 0x30c   : > { %v1031_v54 = vpop.f32.mrf.mxu1 }
 0x393   : > { %v696_v55 = vpop.xlane.xlu0 %695 }
 0x394   : > { %v697_v56 = vsub.f32 %v689_v50, %v696_v55 }
 0x396   : > { %v698_v57 = vpack.c.bf16 %v697_v56, %v697_v56 }
 0x398   : > { %v700_v58 = vmul.bf16 1069105081, %v698_v57 }
 0x39a   : > { %1129 = vpow.bf16 %v700_v58 }
 0x3a8   : > { %v1130_v59 = vpop.eup %1129 }
 0x3a9   : > { %v702_v60 = vunpack.c.l.bf16 %v1130_v59 }
 0x3ab   : > { %v703_v61 = vsel %vm647_vm6, %v702_v60, 0.0 }
 0x3ac   : > { %704 = vadd.xlane.f32.xlu0 %v703_v61 }
 0x435   : > { %v705_v8 = vpop.xlane.xlu0 %704 }
 0x436   : > { %1131 = vrcp.f32 %v705_v8 }
 0x443   : > { %v1132_v9 = vpop.eup %1131 }
 0x444   : > { %v707_v10 = vmul.f32 %v1132_v9, %v702_v60 }
 0x446   : > { %v708_v11 = vpack.c.bf16 %v707_v10, %v707_v10 }
 0x448   : > { %1035 = vmatmul.mubr.msk.bf16.vlgmr.msra.gmra.mxu0 %vm647_vm6, %v708_v11 }
 0x508   : > { %v751_v12 = vpop.f32.mrf.mxu0 }
 0x509   : > { %v758_v13 = vpack.c.bf16 %v751_v12, %v751_v12 }
 0x50a   : > { %v1036_v14 = vpop.f32.mrf.mxu0 }
 0x50b   : > { %1041 = vmatmul.mubr.msk.bf16.vlgmr.msra.gmra.mxu1 %vm647_vm6, %v758_v13 }
 0x50c   : > { %v754_v15 = vpop.f32.mrf.mxu0 }
 0x50e   : > { %v1037_v16 = vpop.f32.mrf.mxu0 }
 0x5cb   : > { %v800_v18 = vpop.f32.mrf.mxu1 }
 0x5cc   : > { %v806_v19 = vadd.f32 %v800_v18, %v757_v17 }
 0x5cd   : > { %v1042_v20 = vpop.f32.mrf.mxu1  ;;  %811 = sbr.rel (%p982_p1) target bundleno = 1495 (0x5d7), region = 60 }
 0x5ce   : > { %807 = vst.msk [vmem:[#allocation3] sm:$0xff] %vm467_vm5, %v806_v19 }
 0x5cf   : > { %v803_v21 = vpop.f32.mrf.mxu1 }
 0x5d1   : > { %v1043_v22 = vpop.f32.mrf.mxu1 }
 0x5d5   : > { %v812_v23 = vld [vmem:[#allocation3] sm:$0xff] }
 0x5d6   : > { %813 = vst.msk [vmem:[%s360_s16] sm:$0xff] %vm467_vm5, %v812_v23 }
 0x5d7 PF: > { %s984_s18 = sshll.u32 %s1213_s9, 7  ;;  %s1507_s24 = sld [smem:[#allocation17_spill]] }
 0x5d8   : > { %s828_s19 = sshll.u32 %s360_s16, 4  ;;  %s1508_s30 = sand.u32 1, %s1201_s28   ;;  %s829_s19 = int_to_ptr.vmem [resolvable:$true] %s828_s19 }
 0x5d9   : > { %s815_s20 = scalar_lea.sflag [#allocation5], %s1508_s30  ;;  %s1133_s13 = scalar_lea.vmem %s829_s19, 128 }
 0x5da   : > { %p1134_p2 = scmp.ne.s32.totalorder %s829_s19, %s1133_s13  ;;  %s1229_s14 = smov [#allocation4]  }
 0x5db   : > { %s1137_s25 = sshll.u32 %s1229_s14, 4  ;;  %s1138_s25 = int_to_ptr.vmem [resolvable:$false] %s1137_s25 }
 0x5dc   : > { %p1135_p4 = pnand %p1134_p2, %p1324_p3  ;;  %s1139_s29 = scalar_lea.vmem %s1138_s25, 256 }
 0x5dd   : > { %s826_s26 = scalar_lea.hbm %s1507_s24, %s984_s18  ;;  %p1140_p6 = scmp.lt.s32.totalorder %s829_s19, %s1138_s25 }
 0x5de   : > { %p1136_p5 = pneg %p1135_p4  ;;  %p1141_p7 = scmp.lt.s32.totalorder %s1139_s29, %s1133_s13 }
 0x5e0   : > { %p1142_p8 = por %p1141_p7, %p1140_p6 }
 0x5e2   : > { %p1143_p10 = pnand %p1142_p8, %p1136_p5 }
 0x5e4   : > { %1146 = shalt.err (!%p1143_p10)
}
 0x5e5   : > { %s1147_s9 = scalar_lea.hbm %s826_s26, 128  ;;  %s1151_s27 = scalar_lea.hbm %s1507_s24, 256 }
 0x5e6   : > { %p1148_p11 = scmp.ne.s32.totalorder %s826_s26, %s1147_s9  ;;  %p1152_p0 = scmp.lt.s32.totalorder %s826_s26, %s1507_s24 }
 0x5e7   : > { %p1153_p1 = scmp.lt.s32.totalorder %s1151_s27, %s1147_s9 }
 0x5e8   : > { %p1149_p12 = pnand %p1148_p11, %p1324_p3 }
 0x5e9   : > { %p1154_p2 = por %p1153_p1, %p1152_p0 }
 0x5ea   : > { %p1150_p13 = pneg %p1149_p12 }
 0x5ec   : > { %p1155_p4 = pnand %p1154_p2, %p1150_p13 }
 0x5ee   : > { %1158 = shalt.err (!%p1155_p4)
}
 0x5ef   : > { %1046 = dma.vmem_to_hbm [thread:$0]  (%p1324_p3), %s829_s19, 128, %s826_s26, %s815_s20  }
 0x5f0 PF: > { %s1509_s12 = sld [smem:[#allocation11_spill]] }
 0x5f1   : > { %s1510_s15 = sld [smem:[#allocation7_spill]] }
 0x5f6   : > { %p1052_p5 = scmp.ge.s32.totalorder %s1509_s12, 2 }
 0x5f7   : > { %s840_s18 = sand.u32 1, %s1510_s15  }
 0x5f8   : > { %p1049_p6 = pnand %p1052_p5, %p1334_p9  ;;  %s841_s21 = scalar_lea.sflag [#allocation5], %s840_s18 }
 0x5fa   : > { %p1050_p7 = pneg %p1049_p6 }
 0x5fc   : > { %1192 = dma.done.wait (%p1050_p7), %s841_s21, 128  }
 0x5fd   : > { %1194 = vsyncadd (%p1050_p7), %s841_s21, 4294967168  ;;  %s21_s12 = sadd.s32 1, %s1509_s12   ;;  %s1512_s22 = sld [smem:[#allocation8_spill]] }
 0x5fe   : > { %p18_p8 = scmp.ge.s32.totalorder %s21_s12, 10   ;;  %s1513_s29 = sld [smem:[#allocation16_spill]] }
 0x5ff   : > { %s1514_s30 = sld [smem:[#allocation9_spill]]  ;;  %s1518_s27 = smov %s1201_s28 }
 0x600   : > { %s1515_s9 = sld [smem:[#allocation10_spill]]  ;;  %20 = sbr.rel (!%p18_p8) target bundleno = 7 (0x7), region = 111 }
 0x601   : > { %s1516_s10 = sld [smem:[#allocation12_spill]] }
 0x602   : > { %s1517_s11 = sld [smem:[#allocation14_spill]] }
 0x603   : > { %s1519_s28 = smov %s1512_s22 }
 0x605   :  { %846 = vsyncpa [#allocation5], 1 }
 0x606   :  { %848 = vsyncpa [#allocation5 + $0x1], 1 }

</bundles_post_ra>
